<compile_context>
chip_gen: v6e
topology: v6e:2x2x1
jax: 0.10.0
libtpu: 0.0.40
codegen_flags: <defaults>
</compile_context>

<pallas_src>
import functools
import numpy as np
import jax
import jax.numpy as jnp
from jax import lax
from jax.experimental import pallas as pl
from jax.experimental.pallas import tpu as pltpu

TN = 256                        # output-channel tile (multiple of 128)
VMEM_LIMIT = 48 * 1024 * 1024   # scoped-VMEM limit, safe on v5e/v6e/v7x (64 MiB/TC)
_X_BLOCK_TARGET = 2 * 1024 * 1024  # aim for ~2 MiB x blocks (mem-bound layers)


def _round_up(n, m):
    return ((n + m - 1) // m) * m


def _cdiv(a, b):
    return -(-a // b)


# ----------------------------- Pallas kernels -----------------------------

def _matmul_bn_kernel(relu, has_res, *refs):
    """o = maybe_relu((x @ w) * scale + bias [+ res]); one full-K block per grid step."""
    if has_res:
        x_ref, w_ref, s_ref, b_ref, r_ref, o_ref = refs
    else:
        x_ref, w_ref, s_ref, b_ref, o_ref = refs
        r_ref = None
    y = jnp.dot(x_ref[...], w_ref[...], preferred_element_type=jnp.float32)
    y = y * s_ref[...] + b_ref[...]
    if r_ref is not None:
        y = y + r_ref[...].astype(jnp.float32)
    if relu:
        y = jnp.maximum(y, 0.0)
    o_ref[...] = y.astype(o_ref.dtype)


def _pick_tiles(M, K, N):
    """Adaptive tiles: ~2 MiB x blocks, and >=2 blocks on a parallel axis when cheap."""
    Nb = N if N <= TN else TN
    grid_n = _cdiv(N, Nb)
    mb = max(256, _X_BLOCK_TARGET // max(2 * K, 1))
    mb = min(int(mb), 4096)
    if mb >= M:
        Mb = M                               # single full-extent block (always legal)
    else:
        Mb = _round_up(mb, 8)
        if Mb >= M:
            Mb = M
    grid_m = _cdiv(M, Mb)
    # keep at least 2 blocks along a parallel axis so v7x's 2 TensorCores both get work
    if grid_m == 1 and grid_n == 1 and M >= 512:
        Mb = _round_up((M + 1) // 2, 8)
        grid_m = _cdiv(M, Mb)
    return Mb, Nb, grid_m, grid_n


@functools.partial(jax.jit, static_argnames=("relu", "out_dtype"))
def matmul_bn(x, w, scale, bias, residual=None, *, relu, out_dtype=jnp.bfloat16):
    """maybe_relu((x @ w) * scale + bias [+ residual]).

    x:(M,K)  w:(K,N)  scale,bias:(N,)  residual: optional (M,N).
    bf16 MXU operands, f32 accumulate + BN epilogue.  K is never padded in HBM: both K
    block dims are full-extent (legal for any K).  M/N boundary blocks are masked by the
    Pallas pipeline, and garbage rows in a boundary x block only affect masked-out output
    rows (row-local matmul + row-local epilogue), so no zero-padding is required.
    """
    M, K = x.shape
    N = w.shape[1]
    xb = x.astype(jnp.bfloat16)
    wb = w.astype(jnp.bfloat16)
    s2 = scale.astype(jnp.float32).reshape(1, N)
    b2 = bias.astype(jnp.float32).reshape(1, N)

    Mb, Nb, grid_m, grid_n = _pick_tiles(M, K, N)

    in_specs = [
        pl.BlockSpec((Mb, K), lambda i, j: (i, 0)),   # full-K block, reused across j
        pl.BlockSpec((K, Nb), lambda i, j: (0, j)),
        pl.BlockSpec((1, Nb), lambda i, j: (0, j)),
        pl.BlockSpec((1, Nb), lambda i, j: (0, j)),
    ]
    args = [xb, wb, s2, b2]
    has_res = residual is not None
    if has_res:
        in_specs.append(pl.BlockSpec((Mb, Nb), lambda i, j: (i, j)))
        args.append(residual.astype(jnp.bfloat16))

    return pl.pallas_call(
        functools.partial(_matmul_bn_kernel, relu, has_res),
        out_shape=jax.ShapeDtypeStruct((M, N), out_dtype),
        grid=(grid_m, grid_n),
        in_specs=in_specs,
        out_specs=pl.BlockSpec((Mb, Nb), lambda i, j: (i, j)),
        compiler_params=pltpu.CompilerParams(
            dimension_semantics=("parallel", "parallel"),
            vmem_limit_bytes=VMEM_LIMIT),
    )(*args)


def _dconv3x3_kernel(relu, H, Wp, x_ref, w_ref, s_ref, b_ref, o_ref):
    """Direct 3x3/stride-1 conv on a flattened padded image.

    x_ref: ((H+3)*Wp, Cin)  -- padded image, rows flattened (Wp = W + 2)
    w_ref: (9, Cin, Cout)   -- tap-major weights
    o_ref: (H*Wp, Cout)     -- 'wide' output (Wp columns per row; 2 junk cols cropped
                               by the wrapper).  Each tap is a contiguous row slab.
    """
    M = H * Wp
    acc = None
    for di in range(3):
        for dj in range(3):
            off = di * Wp + dj
            sl = x_ref[off:off + M, :]
            y = jnp.dot(sl, w_ref[di * 3 + dj], preferred_element_type=jnp.float32)
            acc = y if acc is None else acc + y
    y = acc * s_ref[...] + b_ref[...]
    if relu:
        y = jnp.maximum(y, 0.0)
    o_ref[...] = y.astype(o_ref.dtype)


@functools.partial(jax.jit, static_argnames=("relu",))
def direct_conv3x3_s1(x, w, scale, bias, *, relu):
    """3x3 / stride-1 / pad-1 conv + folded BN (+ReLU) without an HBM im2col tensor."""
    B, H, W, Cin = x.shape
    Cout = w.shape[-1]
    Wp = W + 2
    Lin = (H + 3) * Wp          # top pad 1, bottom pad 2 (extra row absorbs junk-col taps)
    M = H * Wp
    xp = jnp.pad(x.astype(jnp.bfloat16), ((0, 0), (1, 2), (1, 1), (0, 0)))
    xf = xp.reshape(B, Lin, Cin)
    wf = w.astype(jnp.bfloat16).reshape(9, Cin, Cout)
    s2 = scale.astype(jnp.float32).reshape(1, Cout)
    b2 = bias.astype(jnp.float32).reshape(1, Cout)

    out = pl.pallas_call(
        functools.partial(_dconv3x3_kernel, relu, H, Wp),
        out_shape=jax.ShapeDtypeStruct((B, M, Cout), jnp.bfloat16),
        grid=(B,),
        in_specs=[
            pl.BlockSpec((None, Lin, Cin), lambda b: (b, 0, 0)),
            pl.BlockSpec((9, Cin, Cout), lambda b: (0, 0, 0)),
            pl.BlockSpec((1, Cout), lambda b: (0, 0)),
            pl.BlockSpec((1, Cout), lambda b: (0, 0)),
        ],
        out_specs=pl.BlockSpec((None, M, Cout), lambda b: (b, 0, 0)),
        compiler_params=pltpu.CompilerParams(
            dimension_semantics=("parallel",),
            vmem_limit_bytes=VMEM_LIMIT),
    )(xf, wf, s2, b2)
    # crop the 2 junk columns per row (they read across row boundaries)
    return out.reshape(B, H, Wp, Cout)[:, :, :W, :]


def _maxpool3x3s2_kernel(Ho, Wo, x_ref, o_ref):
    """Fused 3x3/stride-2/pad-1 max-pool.

    x_ref: (Hp2, 2, Wp2, 2*C) -- padded image with rows/cols split into (pair, parity)
           and the column parity folded into lanes; every tap is a unit-stride slice.
    o_ref: (Ho, Wo, C)
    """
    C = o_ref.shape[-1]
    m = None
    for dr, ri in ((0, 0), (0, 1), (1, 0)):
        for dc, ci in ((0, 0), (0, 1), (1, 0)):
            t = x_ref[dr:dr + Ho, ri, dc:dc + Wo, ci * C:(ci + 1) * C]
            m = t if m is None else jnp.maximum(m, t)
    o_ref[...] = m


@jax.jit
def maxpool_3x3_s2(x):
    """nn.MaxPool2d(kernel_size=3, stride=2, padding=1) on NHWC, one fused Pallas kernel.

    Zero padding is exact here because the input is post-ReLU (>= 0), so the pad value
    can never win the max (PyTorch pads with -inf).
    """
    B, H, W, C = x.shape
    assert H % 2 == 0 and W % 2 == 0
    Ho, Wo = H // 2, W // 2
    xp = jnp.pad(x, ((0, 0), (1, 1), (1, 1), (0, 0)))           # zeros; see docstring
    Hp2, Wp2 = (H + 2) // 2, (W + 2) // 2
    xr = xp.reshape(B, Hp2, 2, Wp2, 2 * C)                      # free, row-major
    return pl.pallas_call(
        functools.partial(_maxpool3x3s2_kernel, Ho, Wo),
        out_shape=jax.ShapeDtypeStruct((B, Ho, Wo, C), x.dtype),
        grid=(B,),
        in_specs=[pl.BlockSpec((None, Hp2, 2, Wp2, 2 * C),
                               lambda b: (b, 0, 0, 0, 0))],
        out_specs=pl.BlockSpec((None, Ho, Wo, C), lambda b: (b, 0, 0, 0)),
        compiler_params=pltpu.CompilerParams(
            dimension_semantics=("parallel",),
            vmem_limit_bytes=VMEM_LIMIT),
    )(xr)


def _avgpool_kernel(x_ref, o_ref):
    o_ref[...] = jnp.mean(x_ref[...].astype(jnp.float32), axis=1, keepdims=True)


@jax.jit
def global_avg_pool(x):
    """x: (B, HW, C) -> (B, C) mean over HW (AdaptiveAvgPool2d((1,1)) + flatten), f32."""
    B, HW, C = x.shape
    out = pl.pallas_call(
        _avgpool_kernel,
        out_shape=jax.ShapeDtypeStruct((B, 1, C), jnp.float32),
        grid=(B,),
        in_specs=[pl.BlockSpec((1, HW, C), lambda b: (b, 0, 0))],
        out_specs=pl.BlockSpec((1, 1, C), lambda b: (b, 0, 0)),
        compiler_params=pltpu.CompilerParams(
            dimension_semantics=("parallel",),
            vmem_limit_bytes=VMEM_LIMIT),
    )(x)
    return out.reshape(B, C)


# ------------------------ conv / pool / upsample glue ------------------------

@functools.partial(jax.jit, static_argnames=("stride", "pad", "relu"))
def conv_bn(x, w, scale, bias, residual=None, *, stride, pad, relu):
    """NHWC conv (im2col glue + Pallas MXU matmul) with fused BN affine, optional fused
    residual add, and optional ReLU.  Used for 1x1 convs, the 7x7/s2 stem and the three
    stride-2 3x3 convs; stride-1 3x3 convs use direct_conv3x3_s1 instead."""
    B, H, W, Cin = x.shape
    kh, kw, _, Cout = w.shape
    Ho = (H + 2 * pad - kh) // stride + 1
    Wo = (W + 2 * pad - kw) // stride + 1
    if kh == 1 and kw == 1 and pad == 0:
        patches = x[:, ::stride, ::stride, :].reshape(B * Ho * Wo, Cin)
    else:
        # TODO(synk): the remaining strided KxK im2col (stem + 3 stride-2 3x3s) is still
        # materialized by XLA in bf16; a strided direct-conv kernel would remove it.
        xp = jnp.pad(x, ((0, 0), (pad, pad), (pad, pad), (0, 0)))
        cols = [xp[:, di:di + stride * Ho:stride, dj:dj + stride * Wo:stride, :]
                for di in range(kh) for dj in range(kw)]
        patches = jnp.stack(cols, axis=3).reshape(B * Ho * Wo, kh * kw * Cin)
    res2 = None if residual is None else residual.reshape(B * Ho * Wo, Cout)
    out = matmul_bn(patches, w.reshape(kh * kw * Cin, Cout), scale, bias, res2, relu=relu)
    return out.reshape(B, Ho, Wo, Cout)


def _bilinear_matrix(in_size, out_size):
    A = np.zeros((out_size, in_size), np.float32)
    if in_size == 1 or out_size == 1:
        A[:, 0] = 1.0
        return A
    scale = (in_size - 1) / (out_size - 1)
    for i in range(out_size):
        src = i * scale
        i0 = min(int(np.floor(src)), in_size - 1)
        i1 = min(i0 + 1, in_size - 1)
        w1 = src - i0
        A[i, i0] += 1.0 - w1
        A[i, i1] += w1
    return A


@functools.partial(jax.jit, static_argnames=("out_h", "out_w"))
def upsample_bilinear_align_corners(x_nchw, out_h, out_w):
    """nn.Upsample(size=(out_h,out_w), mode='bilinear', align_corners=True) on NCHW input,
    as two separable interpolation matmuls on the Pallas MXU kernel.  Height pass runs
    first on the tiny input; the result is returned directly in NHWC (bf16)."""
    B, C, H, W = x_nchw.shape
    Ah = jnp.asarray(_bilinear_matrix(H, out_h))   # (out_h, H)
    Aw = jnp.asarray(_bilinear_matrix(W, out_w))   # (out_w, W)
    one_h = jnp.ones((out_h,), jnp.float32)
    zero_h = jnp.zeros((out_h,), jnp.float32)
    one_w = jnp.ones((out_w,), jnp.float32)
    zero_w = jnp.zeros((out_w,), jnp.float32)
    # height pass on the tiny input: (B, W, C, H) @ Ah.T -> (B, W, C, out_h)
    t = x_nchw.transpose(0, 3, 1, 2)
    t = matmul_bn(t.reshape(B * W * C, H), Ah.T, one_h, zero_h, relu=False)
    t = t.reshape(B, W, C, out_h).transpose(0, 3, 2, 1)       # (B, out_h, C, W), small
    # width pass: (B*out_h*C, W) @ Aw.T -> (B, out_h, C, out_w)
    t = matmul_bn(t.reshape(B * out_h * C, W), Aw.T, one_w, zero_w, relu=False)
    # single full-size layout change to NHWC
    return t.reshape(B, out_h, C, out_w).transpose(0, 1, 3, 2)


# ----------------------------- parameters -----------------------------

def _conv_bn_params(key, kh, kw, cin, cout):
    kw_, ks, kb = jax.random.split(key, 3)
    std = (2.0 / (kh * kw * cin)) ** 0.5
    # weights pre-cast once to bf16 (native MXU input dtype)
    w = (jax.random.normal(kw_, (kh, kw, cin, cout), jnp.float32) * std).astype(jnp.bfloat16)
    # eval-mode BatchNorm folded to per-channel affine (f32): scale=gamma/sqrt(var+eps),
    # bias=beta-mean*scale.  Deterministic synthetic values near identity.
    scale = 1.0 + 0.05 * jax.random.normal(ks, (cout,), jnp.float32)
    bias = 0.05 * jax.random.normal(kb, (cout,), jnp.float32)
    return w, scale, bias


def make_resnet50_params(key):
    params = {}
    key, k = jax.random.split(key)
    params["stem"] = _conv_bn_params(k, 7, 7, 3, 64)     # conv1 7x7/2 + bn1
    layers = []
    in_c = 64
    for planes, nblocks, stride in [(64, 3, 1), (128, 4, 2), (256, 6, 2), (512, 3, 2)]:
        blocks = []
        for bi in range(nblocks):
            key, k1, k2, k3, k4 = jax.random.split(key, 5)
            blk = {
                "c1": _conv_bn_params(k1, 1, 1, in_c, planes),
                "c2": _conv_bn_params(k2, 3, 3, planes, planes),
                "c3": _conv_bn_params(k3, 1, 1, planes, planes * 4),
                "stride": stride if bi == 0 else 1,
            }
            if bi == 0:   # downsample branch of torchvision Bottleneck
                blk["ds"] = _conv_bn_params(k4, 1, 1, in_c, planes * 4)
            blocks.append(blk)
            in_c = planes * 4
        layers.append(blocks)
    params["layers"] = layers
    return params


# ----------------------------- forward pass -----------------------------

def bottleneck(x, blk):
    w1, s1, b1 = blk["c1"]
    w2, s2, b2 = blk["c2"]
    w3, s3, b3 = blk["c3"]
    stride = blk["stride"]
    out = conv_bn(x, w1, s1, b1, stride=1, pad=0, relu=True)
    if stride == 1:
        out = direct_conv3x3_s1(out, w2, s2, b2, relu=True)     # no HBM im2col
    else:
        out = conv_bn(out, w2, s2, b2, stride=stride, pad=1, relu=True)
    if "ds" in blk:
        wd, sd, bd = blk["ds"]
        identity = conv_bn(x, wd, sd, bd, stride=stride, pad=0, relu=False)
    else:
        identity = x
    # residual add + ReLU fused into the c3 matmul epilogue (no extra HBM pass)
    return conv_bn(out, w3, s3, b3, identity, stride=1, pad=0, relu=True)


def image_encoder_forward(x_nchw, params, get_local=False):
    """ImageEncoder.forward for 'resnet_50': returns pooled (B, 2048), and additionally
    local features (B, 19*19, 1024) (layer3 output, 'b c w h -> b (w h) c') if get_local."""
    # 1) Upsample to 299x299 (bilinear, align_corners=True); result is NHWC bf16.
    x = upsample_bilinear_align_corners(x_nchw, 299, 299)
    # 2) stem: conv1 / bn1 / relu / maxpool
    w, s, b = params["stem"]
    x = conv_bn(x, w, s, b, stride=2, pad=3, relu=True)       # (B,150,150,64)
    x = maxpool_3x3_s2(x)                                      # (B, 75, 75,64)
    # 3) layer1..layer4
    local_features = None
    for li, blocks in enumerate(params["layers"]):
        for blk in blocks:
            x = bottleneck(x, blk)
        if li == 2:
            local_features = x                                 # layer3 out (B,19,19,1024)
    # 4) AdaptiveAvgPool2d((1,1)) + flatten -> (B, 2048) f32
    B, H, W, C = x.shape
    pooled = global_avg_pool(x.reshape(B, H * W, C))
    if not get_local:
        return pooled
    Bl, Hl, Wl, Cl = local_features.shape
    local = local_features.astype(jnp.float32).reshape(Bl, Hl * Wl, Cl)  # 'b c w h -> b (w h) c'
    return pooled, local


if __name__ == "__main__":
    key = jax.random.PRNGKey(0)
    pkey, xkey, ak, bk = jax.random.split(key, 4)

    # sanity check 1: Pallas matmul path (bf16 operands, f32 accumulate)
    a = jax.random.normal(ak, (200, 150), jnp.float32)
    bm = jax.random.normal(bk, (150, 70), jnp.float32)
    got = matmul_bn(a, bm, jnp.ones((70,), jnp.float32),
                    jnp.zeros((70,), jnp.float32), relu=False, out_dtype=jnp.float32)
    ref = jnp.dot(a, bm, precision=lax.Precision.HIGHEST)
    err = float(jnp.max(jnp.abs(got - ref))) / (1.0 + float(jnp.max(jnp.abs(ref))))
    assert err < 2e-2, f"pallas matmul mismatch: {err}"

    # sanity check 2: direct tap-sum 3x3 conv vs the im2col path
    xs = jax.random.normal(jax.random.PRNGKey(1), (1, 12, 12, 8), jnp.float32).astype(jnp.bfloat16)
    ws = (0.1 * jax.random.normal(jax.random.PRNGKey(2), (3, 3, 8, 16), jnp.float32)).astype(jnp.bfloat16)
    sc = jnp.ones((16,), jnp.float32)
    bi = jnp.zeros((16,), jnp.float32)
    d1 = direct_conv3x3_s1(xs, ws, sc, bi, relu=True)
    d2 = conv_bn(xs, ws, sc, bi, stride=1, pad=1, relu=True)
    derr = float(jnp.max(jnp.abs(d1.astype(jnp.float32) - d2.astype(jnp.float32))))
    assert derr < 1e-1, f"direct conv mismatch: {derr}"

    # sanity check 3: fused max-pool vs lax.reduce_window
    xm = jnp.maximum(jax.random.normal(jax.random.PRNGKey(3), (1, 8, 8, 128), jnp.float32), 0.0)
    xm = xm.astype(jnp.bfloat16)
    pm = maxpool_3x3_s2(xm)
    pref = lax.reduce_window(xm.astype(jnp.float32), -jnp.inf, lax.max,
                             (1, 3, 3, 1), (1, 2, 2, 1),
                             ((0, 0), (1, 1), (1, 1), (0, 0)))
    perr = float(jnp.max(jnp.abs(pm.astype(jnp.float32) - pref)))
    assert perr < 1e-2, f"maxpool mismatch: {perr}"

    params = make_resnet50_params(pkey)
    x = jax.random.normal(xkey, (2, 3, 16, 16), jnp.float32)   # NCHW, as in PyTorch

    pooled = image_encoder_forward(x, params, get_local=False)      # default forward()
    pooled_l, local = image_encoder_forward(x, params, get_local=True)
    jax.block_until_ready((pooled, pooled_l, local))

    assert pooled.shape == (2, 2048)
    assert pooled_l.shape == (2, 2048)
    assert local.shape == (2, 19 * 19, 1024)
    assert bool(jnp.all(jnp.isfinite(pooled))) and bool(jnp.all(jnp.isfinite(local)))
    print("KERNEL_OK")
</pallas_src>

<mosaic_0001>
module attributes {stable_mosaic.version = 11 : i64} {
  func.func @_matmul_bn_kernel(%arg0: i32, %arg1: i32, %arg2: memref<200x150xbf16, #tpu.memory_space<vmem>>, %arg3: memref<150x70xbf16, #tpu.memory_space<vmem>>, %arg4: memref<1x70xf32, #tpu.memory_space<vmem>>, %arg5: memref<1x70xf32, #tpu.memory_space<vmem>>, %arg6: memref<200x70xf32, #tpu.memory_space<vmem>>) attributes {dimension_semantics = [#tpu.dimension_semantics<parallel>, #tpu.dimension_semantics<parallel>], iteration_bounds = array<i64: 1, 1>, scalar_prefetch = 0 : i64, scratch_operands = 0 : i64, tpu.core_type = #tpu.core_type<tc>, window_params = [{transform_indices = @transform_0, window_bounds = array<i64: 200, 150>}, {transform_indices = @transform_1, window_bounds = array<i64: 150, 70>}, {transform_indices = @transform_2, window_bounds = array<i64: 1, 70>}, {transform_indices = @transform_3, window_bounds = array<i64: 1, 70>}, {transform_indices = @transform_4, window_bounds = array<i64: 200, 70>}]} {
    %c0 = arith.constant 0 : index
    %c0_0 = arith.constant 0 : index
    %0 = vector.load %arg2[%c0, %c0_0] : memref<200x150xbf16, #tpu.memory_space<vmem>>, vector<200x150xbf16>
    %c0_1 = arith.constant 0 : index
    %c0_2 = arith.constant 0 : index
    %1 = vector.load %arg3[%c0_1, %c0_2] : memref<150x70xbf16, #tpu.memory_space<vmem>>, vector<150x70xbf16>
    %cst = arith.constant dense<0.000000e+00> : vector<200x70xf32>
    %2 = tpu.matmul %0, %1, %cst {dimension_numbers = #tpu.dot_dimension_numbers<[1], [0], [0], [1], [0, 0, 1, 1], [], []>} : vector<200x150xbf16>, vector<150x70xbf16>, vector<200x70xf32> -> vector<200x70xf32>
    %c0_3 = arith.constant 0 : index
    %c0_4 = arith.constant 0 : index
    %3 = vector.load %arg4[%c0_3, %c0_4] : memref<1x70xf32, #tpu.memory_space<vmem>>, vector<1x70xf32>
    %4 = vector.broadcast %3 : vector<1x70xf32> to vector<200x70xf32>
    %5 = arith.mulf %2, %4 : vector<200x70xf32>
    %c0_5 = arith.constant 0 : index
    %c0_6 = arith.constant 0 : index
    %6 = vector.load %arg5[%c0_5, %c0_6] : memref<1x70xf32, #tpu.memory_space<vmem>>, vector<1x70xf32>
    %7 = vector.broadcast %6 : vector<1x70xf32> to vector<200x70xf32>
    %8 = arith.addf %5, %7 : vector<200x70xf32>
    %c0_7 = arith.constant 0 : index
    %c0_8 = arith.constant 0 : index
    %9 = vector.load %arg6[%c0_7, %c0_8] : memref<200x70xf32, #tpu.memory_space<vmem>>, vector<200x70xf32>
    tpu.vector_store %arg6[%c0_7, %c0_8], %8 {strides = array<i32>} : memref<200x70xf32, #tpu.memory_space<vmem>>, vector<200x70xf32>,
    return
  }
  func.func @transform_0(%arg0: i32, %arg1: i32) -> (i32, i32) {
    %c0_i32 = arith.constant 0 : i32
    %c0_i32_0 = arith.constant 0 : i32
    return %arg0, %c0_i32 : i32, i32
  }
  func.func @transform_1(%arg0: i32, %arg1: i32) -> (i32, i32) {
    %c0_i32 = arith.constant 0 : i32
    %c0_i32_0 = arith.constant 0 : i32
    return %c0_i32, %arg1 : i32, i32
  }
  func.func @transform_2(%arg0: i32, %arg1: i32) -> (i32, i32) {
    %c0_i32 = arith.constant 0 : i32
    %c0_i32_0 = arith.constant 0 : i32
    return %c0_i32, %arg1 : i32, i32
  }
  func.func @transform_3(%arg0: i32, %arg1: i32) -> (i32, i32) {
    %c0_i32 = arith.constant 0 : i32
    %c0_i32_0 = arith.constant 0 : i32
    return %c0_i32, %arg1 : i32, i32
  }
  func.func @transform_4(%arg0: i32, %arg1: i32) -> (i32, i32) {
    %c0_i32 = arith.constant 0 : i32
    return %arg0, %arg1 : i32, i32
  }
}

</mosaic_0001>

<bundles_post_ra>
// kernel: matmul_bn.1
= control target key start
LH: loop header
LB: loop body
LE: loop exit
PB: predicated region body
PF: predicated region fallthrough
CT: control target
= control target key end

     0   :  { %v627_v0 = vmov 0   ;;  %vm233_vm0 = vcmask 179200   ;;  %vm273_vm1 = vcmask 1042432   ;;  %vm477_vm2 = vcmask 572416   ;;  %s931_s1 = inlined_call_operand.vmem [shape: bf16[150,70], index: 1, kind: input, shape index: {}]   ;;  %s932_s0 = inlined_call_operand.vmem [shape: bf16[200,150], index: 0, kind: input, shape index: {}]   ;;  %s933_s2 = inlined_call_operand.vmem [shape: f32[1,70], index: 2, kind: input, shape index: {}]   ;;  %s934_s3 = inlined_call_operand.vmem [shape: f32[1,70], index: 3, kind: input, shape index: {}]   ;;  %s935_s4 = inlined_call_operand.vmem [shape: f32[200,70], index: 4, kind: output, shape index: {}]  }
   0x1   :  { %277 = vmatprep.subr.bf16.mxu0 %v627_v0  ;;  %v579_v1 = vld [vmem:[%s931_s1 + $0x38] sm:$0xff]   ;;  %558 = vmatprep.subr.bf16.mxu1 %v627_v0  ;;  %v580_v2 = vld [vmem:[%s931_s1 + $0x30] sm:$0xff]   ;;  %v581_v3 = vld [vmem:[%s931_s1 + $0x28] sm:$0xff]  }
   0x2   :  { %278 = vmatpush1.bf16.msra.mxu0 %v579_v1  ;;  %568 = vmatpush1.bf16.msra.mxu1 %v579_v1  ;;  %v582_v4 = vld [vmem:[%s931_s1 + $0x20] sm:$0xff]   ;;  %v594_v6 = vld [vmem:[%s932_s0 + $0x74] ss:$8 sps:$4 sm:$0xff]   ;;  %v585_v9 = vld [vmem:[%s931_s1 + $0x8] sm:$0xff]  }
   0x3   :  { %279 = vmatprep.subr.bf16.mxu0 %v627_v0  ;;  %559 = vmatprep.subr.bf16.mxu1 %v627_v0  ;;  %v591_v5 = vld [vmem:[%s932_s0 + $0x4] ss:$8 sps:$4 sm:$0xff]   ;;  %v583_v7 = vld [vmem:[%s931_s1 + $0x18] sm:$0xff]   ;;  %v584_v8 = vld [vmem:[%s931_s1 + $0x10] sm:$0xff]  }
   0x4   :  { %543 = vmatprep.mubr.msk.bf16.mxu0 %vm233_vm0, %v591_v5  ;;  %550 = vmatprep.mubr.msk.bf16.mxu1 %vm233_vm0, %v594_v6  ;;  %v586_v10 = vld [vmem:[%s931_s1] sm:$0xff]   ;;  %v587_v11 = vld [vmem:[%s931_s1 + $0x48] ss:$0 sps:$4 sm:$0x77]   ;;  %v592_v15 = vld [vmem:[%s932_s0 + $0x70] ss:$8 sps:$4 sm:$0xff]  }
   0x5   :  { %v275_v12 = vsel %vm273_vm1, %v587_v11, 0  ;;  %v588_v13 = vld [vmem:[%s931_s1 + $0x40] sm:$0xff]   ;;  %v595_v16 = vld [vmem:[%s932_s0 + $0x14] ss:$8 sps:$4 sm:$0xff]   ;;  %v597_v18 = vld [vmem:[%s932_s0 + $0x10] ss:$8 sps:$4 sm:$0xff]  }
   0x6   :  { %280 = vmatpush1.bf16.msra.mxu0 %v580_v2  ;;  %569 = vmatpush1.bf16.msra.mxu1 %v580_v2  ;;  %v589_v14 = vld [vmem:[%s932_s0] ss:$8 sps:$4 sm:$0xff]   ;;  %v598_v17 = vld [vmem:[%s932_s0 + $0x84] ss:$8 sps:$4 sm:$0xff]   ;;  %v604_v21 = vld [vmem:[%s932_s0 + $0x94] ss:$8 sps:$4 sm:$0xff]  }
   0x7   :  { %281 = vmatprep.subr.bf16.mxu0 %v627_v0  ;;  %560 = vmatprep.subr.bf16.mxu1 %v627_v0  ;;  %v600_v19 = vld [vmem:[%s932_s0 + $0x80] ss:$8 sps:$4 sm:$0xff]   ;;  %v601_v20 = vld [vmem:[%s932_s0 + $0x24] ss:$8 sps:$4 sm:$0xff]   ;;  %v606_v23 = vld [vmem:[%s932_s0 + $0x90] ss:$8 sps:$4 sm:$0xff]  }
   0x8   :  { %v603_v22 = vld [vmem:[%s932_s0 + $0x20] ss:$8 sps:$4 sm:$0xff]   ;;  %v607_v24 = vld [vmem:[%s932_s0 + $0x34] ss:$8 sps:$4 sm:$0xff]   ;;  %v610_v25 = vld [vmem:[%s932_s0 + $0xa4] ss:$8 sps:$4 sm:$0xff]  }
   0x9   :  { %v609_v26 = vld [vmem:[%s932_s0 + $0x30] ss:$8 sps:$4 sm:$0xff]   ;;  %v612_v27 = vld [vmem:[%s932_s0 + $0xa0] ss:$8 sps:$4 sm:$0xff]   ;;  %v613_v28 = vld [vmem:[%s932_s0 + $0x44] ss:$8 sps:$4 sm:$0xff]  }
   0xa   :  { %282 = vmatpush1.bf16.msra.mxu0 %v581_v3  ;;  %570 = vmatpush1.bf16.msra.mxu1 %v581_v3  ;;  %v616_v29 = vld [vmem:[%s932_s0 + $0xb4] ss:$8 sps:$4 sm:$0xff]   ;;  %v42_v30 = vld [vmem:[%s932_s0 + $0xc0] sm:$0xff]  ;;  %v618_v32 = vld [vmem:[%s932_s0 + $0xb0] ss:$8 sps:$4 sm:$0xff]  }
   0xb   :  { %283 = vmatprep.subr.bf16.mxu0 %v627_v0  ;;  %561 = vmatprep.subr.bf16.mxu1 %v627_v0  ;;  %v615_v31 = vld [vmem:[%s932_s0 + $0x40] ss:$8 sps:$4 sm:$0xff]   ;;  %v619_v33 = vld [vmem:[%s932_s0 + $0x54] ss:$8 sps:$4 sm:$0xff]   ;;  %v532_v34 = vcombine.high %v42_v30, %v42_v30  ;;  %v621_v35 = vld [vmem:[%s932_s0 + $0x50] ss:$8 sps:$4 sm:$0xff]   ;;  %v531_v36 = vcombine.low %v42_v30, %v42_v30 }
   0xc   :  { %v624_v37 = vld [vmem:[%s932_s0 + $0x64] ss:$8 sps:$4 sm:$0xff]   ;;  %v626_v38 = vld [vmem:[%s932_s0 + $0x60] ss:$8 sps:$4 sm:$0xff]  }
   0xd   :  { %v774_v39 = vld [vmem:[%s933_s2] ss:$0 sm:$0xff] }
   0xe   :  { %284 = vmatpush1.bf16.msra.mxu0 %v582_v4  ;;  %571 = vmatpush1.bf16.msra.mxu1 %v582_v4  ;;  %v779_v41 = vld [vmem:[%s934_s3] ss:$0 sm:$0xff] }
   0xf   :  { %285 = vmatprep.subr.bf16.mxu0 %v627_v0  ;;  %562 = vmatprep.subr.bf16.mxu1 %v627_v0 }
  0x12   :  { %286 = vmatpush1.bf16.msra.mxu0 %v583_v7  ;;  %572 = vmatpush1.bf16.msra.mxu1 %v583_v7 }
  0x13   :  { %287 = vmatprep.subr.bf16.mxu0 %v627_v0  ;;  %563 = vmatprep.subr.bf16.mxu1 %v627_v0 }
  0x16   :  { %288 = vmatpush1.bf16.msra.mxu0 %v584_v8  ;;  %573 = vmatpush1.bf16.msra.mxu1 %v584_v8 }
  0x17   :  { %289 = vmatprep.subr.bf16.mxu0 %v627_v0  ;;  %564 = vmatprep.subr.bf16.mxu1 %v627_v0 }
  0x1a   :  { %290 = vmatpush1.bf16.msra.mxu0 %v585_v9  ;;  %574 = vmatpush1.bf16.msra.mxu1 %v585_v9 }
  0x1b   :  { %291 = vmatprep.subr.bf16.mxu0 %v627_v0  ;;  %565 = vmatprep.subr.bf16.mxu1 %v627_v0 }
  0x1e   :  { %292 = vmatpush1.bf16.msra.mxu0 %v586_v10  ;;  %575 = vmatpush1.bf16.msra.mxu1 %v586_v10 }
  0x1f   :  { %305 = vmatprep.subr.bf16.mxu0 %v627_v0  ;;  %566 = vmatprep.subr.bf16.mxu1 %v627_v0 }
  0x22   :  { %306 = vmatpush2.bf16.msra.mxu0 %v275_v12  ;;  %576 = vmatpush2.bf16.msra.mxu1 %v275_v12 }
  0x23   :  { %307 = vmatprep.subr.bf16.mxu0 %v627_v0  ;;  %567 = vmatprep.subr.bf16.mxu1 %v627_v0 }
  0x26   :  { %308 = vmatpush2.bf16.msra.mxu0 %v588_v13  ;;  %577 = vmatpush2.bf16.msra.mxu1 %v588_v13 }
  0x29   :  { %310 = vmatmul.mubr.bf16.vlgmr.msra.gmra.mxu0 %v589_v14  ;;  %366 = vmatmul.mubr.bf16.vlgmr.msra.gmra.mxu1 %v592_v15 }
  0x2a   :  { %544 = vmatprep.mubr.msk.bf16.mxu0 %vm233_vm0, %v595_v16  ;;  %551 = vmatprep.mubr.msk.bf16.mxu1 %vm233_vm0, %v598_v17 }
  0x31   :  { %318 = vmatmul.mubr.bf16.gmra.mxu0 %v597_v18  ;;  %374 = vmatmul.mubr.bf16.gmra.mxu1 %v600_v19 }
  0x32   :  { %545 = vmatprep.mubr.msk.bf16.mxu0 %vm233_vm0, %v601_v20  ;;  %552 = vmatprep.mubr.msk.bf16.mxu1 %vm233_vm0, %v604_v21 }
  0x39   :  { %326 = vmatmul.mubr.bf16.gmra.mxu0 %v603_v22  ;;  %382 = vmatmul.mubr.bf16.gmra.mxu1 %v606_v23 }
  0x3a   :  { %546 = vmatprep.mubr.msk.bf16.mxu0 %vm233_vm0, %v607_v24  ;;  %553 = vmatprep.mubr.msk.bf16.mxu1 %vm233_vm0, %v610_v25 }
  0x41   :  { %334 = vmatmul.mubr.bf16.gmra.mxu0 %v609_v26  ;;  %390 = vmatmul.mubr.bf16.gmra.mxu1 %v612_v27 }
  0x42   :  { %547 = vmatprep.mubr.msk.bf16.mxu0 %vm233_vm0, %v613_v28  ;;  %554 = vmatprep.mubr.msk.bf16.mxu1 %vm233_vm0, %v616_v29 }
  0x49   :  { %342 = vmatmul.mubr.bf16.gmra.mxu0 %v615_v31  ;;  %398 = vmatmul.mubr.bf16.gmra.mxu1 %v618_v32 }
  0x4a   :  { %548 = vmatprep.mubr.msk.bf16.mxu0 %vm233_vm0, %v619_v33  ;;  %555 = vmatprep.mubr.msk.bf16.mxu1 %vm233_vm0, %v532_v34 }
  0x51   :  { %350 = vmatmul.mubr.bf16.gmra.mxu0 %v621_v35  ;;  %406 = vmatmul.mubr.bf16.gmra.mxu1 %v531_v36 }
  0x52   :  { %549 = vmatprep.mubr.msk.bf16.mxu0 %vm233_vm0, %v624_v37 }
  0x59   :  { %358 = vmatmul.mubr.bf16.gmra.mxu0 %v626_v38 }
  0xe9   :  { %v311_v40 = vpop.f32.mrf.mxu0  ;;  %v367_v42 = vpop.f32.mrf.mxu1 }
  0xea   :  { %v420_v43 = vmul.f32 %v774_v39, %v311_v40  ;;  %v434_v44 = vmul.f32 %v774_v39, %v367_v42 }
  0xeb   :  { %v313_v45 = vpop.f32.mrf.mxu0  ;;  %v369_v46 = vpop.f32.mrf.mxu1 }
  0xec   :  { %v452_v47 = vadd.f32 %v779_v41, %v420_v43  ;;  %v466_v48 = vadd.f32 %v779_v41, %v434_v44 }
  0xed   :  { %v314_v49 = vpop.f32.mrf.mxu0  ;;  %v370_v50 = vpop.f32.mrf.mxu1 }
  0xee   :  { %478 = vst.msk [vmem:[%s935_s4] sm:$0xff] %vm477_vm2, %v452_v47  ;;  %v421_v51 = vmul.f32 %v774_v39, %v314_v49  ;;  %492 = vst.msk [vmem:[%s935_s4 + $0x70] sm:$0xff] %vm477_vm2, %v466_v48  ;;  %v435_v52 = vmul.f32 %v774_v39, %v370_v50 }
  0xef   :  { %v316_v53 = vpop.f32.mrf.mxu0  ;;  %v372_v54 = vpop.f32.mrf.mxu1 }
  0xf0   :  { %v453_v55 = vadd.f32 %v779_v41, %v421_v51  ;;  %v467_v56 = vadd.f32 %v779_v41, %v435_v52 }
  0xf1   :  { %v319_v57 = vpop.f32.mrf.mxu0  ;;  %v375_v58 = vpop.f32.mrf.mxu1 }
  0xf2   :  { %479 = vst.msk [vmem:[%s935_s4 + $0x8] sm:$0xff] %vm477_vm2, %v453_v55  ;;  %v422_v59 = vmul.f32 %v774_v39, %v319_v57  ;;  %493 = vst.msk [vmem:[%s935_s4 + $0x78] sm:$0xff] %vm477_vm2, %v467_v56  ;;  %v436_v60 = vmul.f32 %v774_v39, %v375_v58 }
  0xf3   :  { %v321_v61 = vpop.f32.mrf.mxu0  ;;  %v377_v62 = vpop.f32.mrf.mxu1 }
  0xf4   :  { %v454_v63 = vadd.f32 %v779_v41, %v422_v59  ;;  %v468_v0 = vadd.f32 %v779_v41, %v436_v60 }
  0xf5   :  { %v322_v1 = vpop.f32.mrf.mxu0  ;;  %v378_v2 = vpop.f32.mrf.mxu1 }
  0xf6   :  { %480 = vst.msk [vmem:[%s935_s4 + $0x10] sm:$0xff] %vm477_vm2, %v454_v63  ;;  %v423_v3 = vmul.f32 %v774_v39, %v322_v1  ;;  %494 = vst.msk [vmem:[%s935_s4 + $0x80] sm:$0xff] %vm477_vm2, %v468_v0  ;;  %v437_v4 = vmul.f32 %v774_v39, %v378_v2 }
  0xf7   :  { %v324_v5 = vpop.f32.mrf.mxu0  ;;  %v380_v6 = vpop.f32.mrf.mxu1 }
  0xf8   :  { %v455_v7 = vadd.f32 %v779_v41, %v423_v3  ;;  %v469_v8 = vadd.f32 %v779_v41, %v437_v4 }
  0xf9   :  { %v327_v9 = vpop.f32.mrf.mxu0  ;;  %v383_v10 = vpop.f32.mrf.mxu1 }
  0xfa   :  { %481 = vst.msk [vmem:[%s935_s4 + $0x18] sm:$0xff] %vm477_vm2, %v455_v7  ;;  %v424_v11 = vmul.f32 %v774_v39, %v327_v9  ;;  %495 = vst.msk [vmem:[%s935_s4 + $0x88] sm:$0xff] %vm477_vm2, %v469_v8  ;;  %v438_v12 = vmul.f32 %v774_v39, %v383_v10 }
  0xfb   :  { %v329_v13 = vpop.f32.mrf.mxu0  ;;  %v385_v14 = vpop.f32.mrf.mxu1 }
  0xfc   :  { %v456_v15 = vadd.f32 %v779_v41, %v424_v11  ;;  %v470_v16 = vadd.f32 %v779_v41, %v438_v12 }
  0xfd   :  { %v330_v17 = vpop.f32.mrf.mxu0  ;;  %v386_v18 = vpop.f32.mrf.mxu1 }
  0xfe   :  { %482 = vst.msk [vmem:[%s935_s4 + $0x20] sm:$0xff] %vm477_vm2, %v456_v15  ;;  %v425_v19 = vmul.f32 %v774_v39, %v330_v17  ;;  %496 = vst.msk [vmem:[%s935_s4 + $0x90] sm:$0xff] %vm477_vm2, %v470_v16  ;;  %v439_v20 = vmul.f32 %v774_v39, %v386_v18 }
  0xff   :  { %v332_v21 = vpop.f32.mrf.mxu0  ;;  %v388_v22 = vpop.f32.mrf.mxu1 }
 0x100   :  { %v457_v23 = vadd.f32 %v779_v41, %v425_v19  ;;  %v471_v24 = vadd.f32 %v779_v41, %v439_v20 }
 0x101   :  { %v335_v25 = vpop.f32.mrf.mxu0  ;;  %v391_v26 = vpop.f32.mrf.mxu1 }
 0x102   :  { %483 = vst.msk [vmem:[%s935_s4 + $0x28] sm:$0xff] %vm477_vm2, %v457_v23  ;;  %v426_v27 = vmul.f32 %v774_v39, %v335_v25  ;;  %497 = vst.msk [vmem:[%s935_s4 + $0x98] sm:$0xff] %vm477_vm2, %v471_v24  ;;  %v440_v28 = vmul.f32 %v774_v39, %v391_v26 }
 0x103   :  { %v337_v29 = vpop.f32.mrf.mxu0  ;;  %v393_v30 = vpop.f32.mrf.mxu1 }
 0x104   :  { %v458_v31 = vadd.f32 %v779_v41, %v426_v27  ;;  %v472_v32 = vadd.f32 %v779_v41, %v440_v28 }
 0x105   :  { %v338_v33 = vpop.f32.mrf.mxu0  ;;  %v394_v34 = vpop.f32.mrf.mxu1 }
 0x106   :  { %484 = vst.msk [vmem:[%s935_s4 + $0x30] sm:$0xff] %vm477_vm2, %v458_v31  ;;  %v427_v35 = vmul.f32 %v774_v39, %v338_v33  ;;  %498 = vst.msk [vmem:[%s935_s4 + $0xa0] sm:$0xff] %vm477_vm2, %v472_v32  ;;  %v441_v36 = vmul.f32 %v774_v39, %v394_v34 }
 0x107   :  { %v340_v37 = vpop.f32.mrf.mxu0  ;;  %v396_v38 = vpop.f32.mrf.mxu1 }
 0x108   :  { %v459_v40 = vadd.f32 %v779_v41, %v427_v35  ;;  %v473_v42 = vadd.f32 %v779_v41, %v441_v36 }
 0x109   :  { %v343_v43 = vpop.f32.mrf.mxu0  ;;  %v399_v44 = vpop.f32.mrf.mxu1 }
 0x10a   :  { %485 = vst.msk [vmem:[%s935_s4 + $0x38] sm:$0xff] %vm477_vm2, %v459_v40  ;;  %v428_v45 = vmul.f32 %v774_v39, %v343_v43  ;;  %499 = vst.msk [vmem:[%s935_s4 + $0xa8] sm:$0xff] %vm477_vm2, %v473_v42  ;;  %v442_v46 = vmul.f32 %v774_v39, %v399_v44 }
 0x10b   :  { %v345_v47 = vpop.f32.mrf.mxu0  ;;  %v401_v48 = vpop.f32.mrf.mxu1 }
 0x10c   :  { %v460_v49 = vadd.f32 %v779_v41, %v428_v45  ;;  %v474_v50 = vadd.f32 %v779_v41, %v442_v46 }
 0x10d   :  { %v346_v51 = vpop.f32.mrf.mxu0  ;;  %v402_v52 = vpop.f32.mrf.mxu1 }
 0x10e   :  { %486 = vst.msk [vmem:[%s935_s4 + $0x40] sm:$0xff] %vm477_vm2, %v460_v49  ;;  %v429_v53 = vmul.f32 %v774_v39, %v346_v51  ;;  %500 = vst.msk [vmem:[%s935_s4 + $0xb0] sm:$0xff] %vm477_vm2, %v474_v50  ;;  %v443_v54 = vmul.f32 %v774_v39, %v402_v52 }
 0x10f   :  { %v348_v55 = vpop.f32.mrf.mxu0  ;;  %v404_v56 = vpop.f32.mrf.mxu1 }
 0x110   :  { %v461_v57 = vadd.f32 %v779_v41, %v429_v53  ;;  %v475_v58 = vadd.f32 %v779_v41, %v443_v54 }
 0x111   :  { %v351_v59 = vpop.f32.mrf.mxu0  ;;  %v407_v60 = vpop.f32.mrf.mxu1 }
 0x112   :  { %487 = vst.msk [vmem:[%s935_s4 + $0x48] sm:$0xff] %vm477_vm2, %v461_v57  ;;  %v430_v61 = vmul.f32 %v774_v39, %v351_v59  ;;  %501 = vst.msk [vmem:[%s935_s4 + $0xb8] sm:$0xff] %vm477_vm2, %v475_v58  ;;  %v444_v62 = vmul.f32 %v774_v39, %v407_v60 }
 0x113   :  { %v353_v63 = vpop.f32.mrf.mxu0  ;;  %v409_v0 = vpop.f32.mrf.mxu1 }
 0x114   :  { %v462_v1 = vadd.f32 %v779_v41, %v430_v61  ;;  %v476_v2 = vadd.f32 %v779_v41, %v444_v62 }
 0x115   :  { %v354_v3 = vpop.f32.mrf.mxu0  ;;  %v410_v4 = vpop.f32.mrf.mxu1 }
 0x116   :  { %488 = vst.msk [vmem:[%s935_s4 + $0x50] sm:$0xff] %vm477_vm2, %v462_v1  ;;  %v431_v5 = vmul.f32 %v774_v39, %v354_v3  ;;  %502 = vst.msk [vmem:[%s935_s4 + $0xc0] sm:$0xff] %vm477_vm2, %v476_v2 }
 0x117   :  { %v356_v6 = vpop.f32.mrf.mxu0  ;;  %v411_v7 = vpop.f32.mrf.mxu1 }
 0x118   :  { %v463_v8 = vadd.f32 %v779_v41, %v431_v5 }
 0x119   :  { %v359_v9 = vpop.f32.mrf.mxu0 }
 0x11a   :  { %489 = vst.msk [vmem:[%s935_s4 + $0x58] sm:$0xff] %vm477_vm2, %v463_v8  ;;  %v432_v10 = vmul.f32 %v774_v39, %v359_v9 }
 0x11b   :  { %v361_v11 = vpop.f32.mrf.mxu0 }
 0x11c   :  { %v464_v12 = vadd.f32 %v779_v41, %v432_v10 }
 0x11d   :  { %v362_v13 = vpop.f32.mrf.mxu0 }
 0x11e   :  { %490 = vst.msk [vmem:[%s935_s4 + $0x60] sm:$0xff] %vm477_vm2, %v464_v12  ;;  %v433_v14 = vmul.f32 %v774_v39, %v362_v13 }
 0x11f   :  { %v364_v15 = vpop.f32.mrf.mxu0 }
 0x120   :  { %v465_v16 = vadd.f32 %v779_v41, %v433_v14 }
 0x122   :  { %491 = vst.msk [vmem:[%s935_s4 + $0x68] sm:$0xff] %vm477_vm2, %v465_v16 }

</bundles_post_ra>
